<compile_context>
chip_gen: v6e
topology: v6e:2x2x1
jax: 0.10.0
libtpu: 0.0.40
codegen_flags: <defaults>
</compile_context>

<pallas_src>
import functools
import math

import jax
import jax.numpy as jnp
from jax import lax
from jax.experimental import pallas as pl
from jax.experimental.pallas import tpu as pltpu

N_LAYER = 2


def mlayer_attn_kernel(x_ref, m_mid_ref, m_last_ref, w_ref, wn_ref, o_ref, *,
                       n_layer, mxu_dtype):
    """One grid step = one batch block.

    x_ref      : (BB, T, D)           batch block of the input sequence
    m_mid_ref  : (n_layer-1, D, D)    fused M_i = Wq_i^T @ Wk_i for layers < last
    m_last_ref : (D, D)               fused M of the final layer
    w_ref      : (n_layer-1, D, D)    inter-layer mixing matrices (wlist)
    wn_ref     : (1, D)               final projection vector wn (row layout)
    o_ref      : (1, 1, BB)           lane-dense per-block output
    """
    bb, t, d = x_ref.shape
    prev = x_ref[...]                                                # (BB,T,D) f32

    # ---- layers 0 .. n_layer-2: full-sequence attention, K projection fused away
    for i in range(n_layer - 1):                                     # static unroll
        prev_c = prev.astype(mxu_dtype)
        qf = jnp.dot(prev_c.reshape(bb * t, d), m_mid_ref[i].astype(mxu_dtype),
                     preferred_element_type=jnp.float32).reshape(bb, t, d)
        s = jnp.einsum('bqd,bkd->bqk', qf.astype(mxu_dtype), prev_c,
                       preferred_element_type=jnp.float32)           # (BB,T,T)
        e = jnp.exp(s - jnp.max(s, axis=-1, keepdims=True))
        a = e * pl.reciprocal(jnp.sum(e, axis=-1, keepdims=True), approx=True)
        out = jnp.einsum('bqk,bkd->bqd', a.astype(mxu_dtype), prev_c,
                         preferred_element_type=jnp.float32)         # (BB,T,D)
        prev = jnp.dot(out.reshape(bb * t, d).astype(mxu_dtype),
                       w_ref[i].astype(mxu_dtype),
                       preferred_element_type=jnp.float32).reshape(bb, t, d)

    # ---- final layer: only row 0 of its output is consumed by (out@wn)[:,0] ----
    prev_c = prev.astype(mxu_dtype)
    q0 = jnp.dot(prev[:, 0, :].astype(mxu_dtype), m_last_ref[...].astype(mxu_dtype),
                 preferred_element_type=jnp.float32).reshape(bb, 1, d)
    s0 = jnp.einsum('bqd,bkd->bqk', q0.astype(mxu_dtype), prev_c,
                    preferred_element_type=jnp.float32)              # (BB,1,T)
    e0 = jnp.exp(s0 - jnp.max(s0, axis=-1, keepdims=True))
    a0 = e0 * pl.reciprocal(jnp.sum(e0, axis=-1, keepdims=True), approx=True)
    out0 = jnp.einsum('bqk,bkd->bqd', a0.astype(mxu_dtype), prev_c,
                      preferred_element_type=jnp.float32)            # (BB,1,D)

    # y[b] = out0[b] . wn  ->  emitted lane-dense as (1, 1, BB) in one store.
    y = lax.dot_general(wn_ref[...].astype(mxu_dtype),
                        out0.reshape(bb, d).astype(mxu_dtype),
                        dimension_numbers=(((1,), (1,)), ((), ())),
                        preferred_element_type=jnp.float32)          # (1, BB)
    o_ref[...] = y.reshape(1, 1, bb)


def mlayer_attn(x, wq, wk, w, wn, *, block_b=None, mxu_dtype=jnp.bfloat16,
                vmem_limit_bytes=None):
    """x: (B,T,D); wq/wk: (n_layer,D,D) pre-transposed (q = x @ wq);
    w: (n_layer-1,D,D); wn: (D,)."""
    B, T, D = x.shape
    n_layer = wq.shape[0]
    assert n_layer >= 2 and wk.shape[0] == n_layer and w.shape[0] == n_layer - 1

    if block_b is None:
        # G >= 2: v7x megacore sharding + software pipelining of the x DMA.
        # For large B prefer a multiple of 128 (lane-dense unmasked output vst);
        # for v7x's 64 MiB VMEM halve this again and set vmem_limit_bytes.
        block_b = B // 2 if (B >= 2 and B % 2 == 0) else B
    assert B % block_b == 0
    G = B // block_b

    # Algebraic Q/K fusion: M_l = wq_l @ wk_l^T  (so scores = (prev@M) . prev).
    m_all = jnp.einsum('ldk,lek->lde', wq, wk)          # (n_layer, D, D)
    m_mid = m_all[:n_layer - 1]
    m_last = m_all[n_layer - 1]
    wn_row = wn.reshape(1, D)

    cp_kwargs = dict(dimension_semantics=("parallel",))
    if vmem_limit_bytes is not None:
        cp_kwargs["vmem_limit_bytes"] = vmem_limit_bytes

    kernel = functools.partial(mlayer_attn_kernel, n_layer=n_layer,
                               mxu_dtype=mxu_dtype)

    out = pl.pallas_call(
        kernel,
        out_shape=jax.ShapeDtypeStruct((G, 1, block_b), jnp.float32),
        grid=(G,),
        in_specs=[
            pl.BlockSpec((block_b, T, D), lambda g: (g, 0, 0)),
            pl.BlockSpec((n_layer - 1, D, D), lambda g: (0, 0, 0)),
            pl.BlockSpec((D, D), lambda g: (0, 0)),
            pl.BlockSpec((n_layer - 1, D, D), lambda g: (0, 0, 0)),
            pl.BlockSpec((1, D), lambda g: (0, 0)),
        ],
        # Last two block dims equal the full array dims -> tiling-legal for any G.
        out_specs=pl.BlockSpec((1, 1, block_b), lambda g: (g, 0, 0)),
        compiler_params=pltpu.CompilerParams(**cp_kwargs),
    )(x, m_mid, m_last, w, wn_row)
    return out.reshape(B)


def mlayer_attn_ref(x, wq, wk, w, wn):
    """Pure-JAX reference mirroring the PyTorch forward (strict f32)."""
    n_layer = wq.shape[0]
    prev = x
    out = prev
    for i in range(n_layer):
        q = prev @ wq[i]
        k = prev @ wk[i]
        a = jax.nn.softmax(jnp.einsum('bqd,bkd->bqk', q, k), axis=-1)
        out = jnp.einsum('bqk,bkd->bqd', a, prev)
        if i < n_layer - 1:
            prev = out @ w[i]
    return (out @ wn)[:, 0]


if __name__ == "__main__":
    B, T, D = 2, 8, 32  # batch=2, seq=8, input_size=32 (dim_m = input_size)
    key = jax.random.PRNGKey(0)
    k_x, k_q, k_k, k_w, k_wn = jax.random.split(key, 5)

    x = jax.random.normal(k_x, (B, T, D), dtype=jnp.float32)

    # nn.Linear(D, D, bias=False) default init: U(-1/sqrt(D), 1/sqrt(D)), weight (D, D);
    # PyTorch computes x @ W^T, so pre-transpose once in the wrapper-side prep.
    stdv = 1.0 / math.sqrt(D)
    wq_raw = jax.random.uniform(k_q, (N_LAYER, D, D), jnp.float32, -stdv, stdv)
    wk_raw = jax.random.uniform(k_k, (N_LAYER, D, D), jnp.float32, -stdv, stdv)
    wq = jnp.swapaxes(wq_raw, -2, -1)
    wk = jnp.swapaxes(wk_raw, -2, -1)

    # identity_V=False -> wlist[i] = randn(D, D) * 0.01
    w = 0.01 * jax.random.normal(k_w, (N_LAYER - 1, D, D), dtype=jnp.float32)
    # wn = randn(D) * 0.01
    wn = 0.01 * jax.random.normal(k_wn, (D,), dtype=jnp.float32)

    ref = mlayer_attn_ref(x, wq, wk, w, wn)

    # Default fast path: bf16 MXU operands, f32 accumulation, approx reciprocal.
    out_fast = mlayer_attn(x, wq, wk, w, wn)
    jax.block_until_ready(out_fast)
    assert out_fast.shape == (B,), out_fast.shape

    # Strict-f32 mode (same kernel, mxu_dtype flag) for a tight numerics check.
    out_f32 = mlayer_attn(x, wq, wk, w, wn, mxu_dtype=jnp.float32)
    jax.block_until_ready(out_f32)

    # f32 path: only the approx EUP reciprocal + Wq@Wk^T reassociation differ
    # from the reference -> tight tolerance.
    if not jnp.allclose(out_f32, ref, atol=1e-4, rtol=2e-3):
        raise AssertionError(f"f32 mismatch: pallas={out_f32}, ref={ref}")
    # bf16-operand path: deliberate precision trade per the perf review.
    if not jnp.allclose(out_fast, ref, atol=5e-4, rtol=2e-2):
        raise AssertionError(f"bf16 mismatch: pallas={out_fast}, ref={ref}")

    # TODO(synk): cross_attn / regress / skip / layer_norm branches and
    # output_mode='sum' + the `disp` debug printing are not exercised in this
    # configuration.
    print("KERNEL_OK")
</pallas_src>

<mosaic_0001>
module attributes {stable_mosaic.version = 11 : i64} {
  func.func @mlayer_attn_kernel(%arg0: i32, %arg1: memref<1x8x32xf32, #tpu.memory_space<vmem>>, %arg2: memref<1x32x32xf32, #tpu.memory_space<vmem>>, %arg3: memref<32x32xf32, #tpu.memory_space<vmem>>, %arg4: memref<1x32x32xf32, #tpu.memory_space<vmem>>, %arg5: memref<1x32xf32, #tpu.memory_space<vmem>>, %arg6: memref<1x1x1xf32, #tpu.memory_space<vmem>>) attributes {dimension_semantics = [#tpu.dimension_semantics<parallel>], iteration_bounds = array<i64: 2>, scalar_prefetch = 0 : i64, scratch_operands = 0 : i64, tpu.core_type = #tpu.core_type<tc>, window_params = [{transform_indices = @transform_0, window_bounds = array<i64: 1, 8, 32>}, {pipeline_mode = #tpu.pipeline_mode<synchronous>, transform_indices = @transform_1, window_bounds = array<i64: 1, 32, 32>}, {pipeline_mode = #tpu.pipeline_mode<synchronous>, transform_indices = @transform_2, window_bounds = array<i64: 32, 32>}, {pipeline_mode = #tpu.pipeline_mode<synchronous>, transform_indices = @transform_3, window_bounds = array<i64: 1, 32, 32>}, {pipeline_mode = #tpu.pipeline_mode<synchronous>, transform_indices = @transform_4, window_bounds = array<i64: 1, 32>}, {transform_indices = @transform_5, window_bounds = array<i64: 1, 1, 1>}]} {
    %c0 = arith.constant 0 : index
    %c0_0 = arith.constant 0 : index
    %c0_1 = arith.constant 0 : index
    %0 = vector.load %arg1[%c0, %c0_0, %c0_1] : memref<1x8x32xf32, #tpu.memory_space<vmem>>, vector<1x8x32xf32>
    %1 = arith.truncf %0 : vector<1x8x32xf32> to vector<1x8x32xbf16>
    %2 = vector.shape_cast %1 : vector<1x8x32xbf16> to vector<8x32xbf16>
    %c0_2 = arith.constant 0 : index
    %c0_3 = arith.constant 0 : index
    %c0_4 = arith.constant 0 : index
    %3 = vector.load %arg2[%c0_2, %c0_3, %c0_4] : memref<1x32x32xf32, #tpu.memory_space<vmem>>, vector<1x32x32xf32>
    %4 = vector.shape_cast %3 : vector<1x32x32xf32> to vector<32x32xf32>
    %5 = arith.truncf %4 : vector<32x32xf32> to vector<32x32xbf16>
    %cst = arith.constant dense<0.000000e+00> : vector<8x32xf32>
    %6 = tpu.matmul %2, %5, %cst {dimension_numbers = #tpu.dot_dimension_numbers<[1], [0], [0], [1], [0, 0, 1, 1], [], []>} : vector<8x32xbf16>, vector<32x32xbf16>, vector<8x32xf32> -> vector<8x32xf32>
    %7 = vector.shape_cast %6 : vector<8x32xf32> to vector<1x8x32xf32>
    %8 = arith.truncf %7 : vector<1x8x32xf32> to vector<1x8x32xbf16>
    "tpu.trace_start"() <{level = 10 : i32, message = "bqd,bkd->bqk"}> : () -> ()
    %cst_5 = arith.constant dense<0.000000e+00> : vector<1x8x8xf32>
    %9 = tpu.matmul %8, %1, %cst_5 {dimension_numbers = #tpu.dot_dimension_numbers<[2], [2], [1], [1], [0, 0, 0, 1, 1, 1], [0], [0]>} : vector<1x8x32xbf16>, vector<1x8x32xbf16>, vector<1x8x8xf32> -> vector<1x8x8xf32>
    "tpu.trace_stop"() : () -> ()
    %cst_6 = arith.constant dense<0xFF800000> : vector<1x8xf32>
    %10 = vector.multi_reduction <maximumf>, %9, %cst_6 [2] : vector<1x8x8xf32> to vector<1x8xf32>
    %11 = vector.shape_cast %10 : vector<1x8xf32> to vector<1x8x1xf32>
    %12 = vector.broadcast %11 : vector<1x8x1xf32> to vector<1x8x8xf32>
    %13 = arith.subf %9, %12 : vector<1x8x8xf32>
    %14 = math.exp %13 : vector<1x8x8xf32>
    %cst_7 = arith.constant dense<0.000000e+00> : vector<1x8xf32>
    %15 = vector.multi_reduction <add>, %14, %cst_7 [2] : vector<1x8x8xf32> to vector<1x8xf32>
    %16 = vector.shape_cast %15 : vector<1x8xf32> to vector<1x8x1xf32>
    %17 = tpu.reciprocal %16 {approx = true} : vector<1x8x1xf32> -> vector<1x8x1xf32>
    %18 = vector.broadcast %17 : vector<1x8x1xf32> to vector<1x8x8xf32>
    %19 = arith.mulf %14, %18 : vector<1x8x8xf32>
    %20 = arith.truncf %19 : vector<1x8x8xf32> to vector<1x8x8xbf16>
    "tpu.trace_start"() <{level = 10 : i32, message = "bqk,bkd->bqd"}> : () -> ()
    %cst_8 = arith.constant dense<0.000000e+00> : vector<1x8x32xf32>
    %21 = tpu.matmul %20, %1, %cst_8 {dimension_numbers = #tpu.dot_dimension_numbers<[2], [1], [1], [2], [0, 0, 0, 1, 1, 2], [0], [0]>} : vector<1x8x8xbf16>, vector<1x8x32xbf16>, vector<1x8x32xf32> -> vector<1x8x32xf32>
    "tpu.trace_stop"() : () -> ()
    %22 = vector.shape_cast %21 : vector<1x8x32xf32> to vector<8x32xf32>
    %23 = arith.truncf %22 : vector<8x32xf32> to vector<8x32xbf16>
    %c0_9 = arith.constant 0 : index
    %c0_10 = arith.constant 0 : index
    %c0_11 = arith.constant 0 : index
    %24 = vector.load %arg4[%c0_9, %c0_10, %c0_11] : memref<1x32x32xf32, #tpu.memory_space<vmem>>, vector<1x32x32xf32>
    %25 = vector.shape_cast %24 : vector<1x32x32xf32> to vector<32x32xf32>
    %26 = arith.truncf %25 : vector<32x32xf32> to vector<32x32xbf16>
    %cst_12 = arith.constant dense<0.000000e+00> : vector<8x32xf32>
    %27 = tpu.matmul %23, %26, %cst_12 {dimension_numbers = #tpu.dot_dimension_numbers<[1], [0], [0], [1], [0, 0, 1, 1], [], []>} : vector<8x32xbf16>, vector<32x32xbf16>, vector<8x32xf32> -> vector<8x32xf32>
    %28 = vector.shape_cast %27 : vector<8x32xf32> to vector<1x8x32xf32>
    %29 = arith.truncf %28 : vector<1x8x32xf32> to vector<1x8x32xbf16>
    %30 = vector.extract_strided_slice %28 {offsets = [0, 0, 0], sizes = [1, 1, 32], strides = [1, 1, 1]} : vector<1x8x32xf32> to vector<1x1x32xf32>
    %31 = vector.shape_cast %30 : vector<1x1x32xf32> to vector<1x32xf32>
    %32 = arith.truncf %31 : vector<1x32xf32> to vector<1x32xbf16>
    %c0_13 = arith.constant 0 : index
    %c0_14 = arith.constant 0 : index
    %33 = vector.load %arg3[%c0_13, %c0_14] : memref<32x32xf32, #tpu.memory_space<vmem>>, vector<32x32xf32>
    %34 = arith.truncf %33 : vector<32x32xf32> to vector<32x32xbf16>
    %cst_15 = arith.constant dense<0.000000e+00> : vector<1x32xf32>
    %35 = tpu.matmul %32, %34, %cst_15 {dimension_numbers = #tpu.dot_dimension_numbers<[1], [0], [0], [1], [0, 0, 1, 1], [], []>} : vector<1x32xbf16>, vector<32x32xbf16>, vector<1x32xf32> -> vector<1x32xf32>
    %36 = vector.shape_cast %35 : vector<1x32xf32> to vector<1x1x32xf32>
    %37 = arith.truncf %36 : vector<1x1x32xf32> to vector<1x1x32xbf16>
    "tpu.trace_start"() <{level = 10 : i32, message = "bqd,bkd->bqk"}> : () -> ()
    %cst_16 = arith.constant dense<0.000000e+00> : vector<1x1x8xf32>
    %38 = tpu.matmul %37, %29, %cst_16 {dimension_numbers = #tpu.dot_dimension_numbers<[2], [2], [1], [1], [0, 0, 0, 1, 1, 1], [0], [0]>} : vector<1x1x32xbf16>, vector<1x8x32xbf16>, vector<1x1x8xf32> -> vector<1x1x8xf32>
    "tpu.trace_stop"() : () -> ()
    %cst_17 = arith.constant dense<0xFF800000> : vector<1x1xf32>
    %39 = vector.multi_reduction <maximumf>, %38, %cst_17 [2] : vector<1x1x8xf32> to vector<1x1xf32>
    %40 = vector.shape_cast %39 : vector<1x1xf32> to vector<1x1x1xf32>
    %41 = vector.broadcast %40 : vector<1x1x1xf32> to vector<1x1x8xf32>
    %42 = arith.subf %38, %41 : vector<1x1x8xf32>
    %43 = math.exp %42 : vector<1x1x8xf32>
    %cst_18 = arith.constant dense<0.000000e+00> : vector<1x1xf32>
    %44 = vector.multi_reduction <add>, %43, %cst_18 [2] : vector<1x1x8xf32> to vector<1x1xf32>
    %45 = vector.shape_cast %44 : vector<1x1xf32> to vector<1x1x1xf32>
    %46 = tpu.reciprocal %45 {approx = true} : vector<1x1x1xf32> -> vector<1x1x1xf32>
    %47 = vector.broadcast %46 : vector<1x1x1xf32> to vector<1x1x8xf32>
    %48 = arith.mulf %43, %47 : vector<1x1x8xf32>
    %49 = arith.truncf %48 : vector<1x1x8xf32> to vector<1x1x8xbf16>
    "tpu.trace_start"() <{level = 10 : i32, message = "bqk,bkd->bqd"}> : () -> ()
    %cst_19 = arith.constant dense<0.000000e+00> : vector<1x1x32xf32>
    %50 = tpu.matmul %49, %29, %cst_19 {dimension_numbers = #tpu.dot_dimension_numbers<[2], [1], [1], [2], [0, 0, 0, 1, 1, 2], [0], [0]>} : vector<1x1x8xbf16>, vector<1x8x32xbf16>, vector<1x1x32xf32> -> vector<1x1x32xf32>
    "tpu.trace_stop"() : () -> ()
    %c0_20 = arith.constant 0 : index
    %c0_21 = arith.constant 0 : index
    %51 = vector.load %arg5[%c0_20, %c0_21] : memref<1x32xf32, #tpu.memory_space<vmem>>, vector<1x32xf32>
    %52 = arith.truncf %51 : vector<1x32xf32> to vector<1x32xbf16>
    %53 = vector.shape_cast %50 : vector<1x1x32xf32> to vector<1x32xf32>
    %54 = arith.truncf %53 : vector<1x32xf32> to vector<1x32xbf16>
    %55 = arith.extf %52 : vector<1x32xbf16> to vector<1x32xf32>
    %56 = arith.extf %54 : vector<1x32xbf16> to vector<1x32xf32>
    %cst_22 = arith.constant dense<0.000000e+00> : vector<1xf32>
    %57 = arith.mulf %55, %56 : vector<1x32xf32>
    %58 = vector.multi_reduction <add>, %57, %cst_22 [1] : vector<1x32xf32> to vector<1xf32>
    %59 = vector.shape_cast %58 : vector<1xf32> to vector<1x1xf32>
    %60 = vector.shape_cast %59 : vector<1x1xf32> to vector<1x1x1xf32>
    %c0_23 = arith.constant 0 : index
    %c0_24 = arith.constant 0 : index
    %c0_25 = arith.constant 0 : index
    %61 = vector.load %arg6[%c0_23, %c0_24, %c0_25] : memref<1x1x1xf32, #tpu.memory_space<vmem>>, vector<1x1x1xf32>
    tpu.vector_store %arg6[%c0_23, %c0_24, %c0_25], %60 {strides = array<i32>} : memref<1x1x1xf32, #tpu.memory_space<vmem>>, vector<1x1x1xf32>,
    return
  }
  func.func @transform_0(%arg0: i32) -> (i32, i32, i32) {
    %c0_i32 = arith.constant 0 : i32
    %c0_i32_0 = arith.constant 0 : i32
    %c0_i32_1 = arith.constant 0 : i32
    return %arg0, %c0_i32, %c0_i32_0 : i32, i32, i32
  }
  func.func @transform_1(%arg0: i32) -> (i32, i32, i32) {
    %c0_i32 = arith.constant 0 : i32
    %c0_i32_0 = arith.constant 0 : i32
    %c0_i32_1 = arith.constant 0 : i32
    %c0_i32_2 = arith.constant 0 : i32
    return %c0_i32, %c0_i32_0, %c0_i32_1 : i32, i32, i32
  }
  func.func @transform_2(%arg0: i32) -> (i32, i32) {
    %c0_i32 = arith.constant 0 : i32
    %c0_i32_0 = arith.constant 0 : i32
    %c0_i32_1 = arith.constant 0 : i32
    return %c0_i32, %c0_i32_0 : i32, i32
  }
  func.func @transform_3(%arg0: i32) -> (i32, i32, i32) {
    %c0_i32 = arith.constant 0 : i32
    %c0_i32_0 = arith.constant 0 : i32
    %c0_i32_1 = arith.constant 0 : i32
    %c0_i32_2 = arith.constant 0 : i32
    return %c0_i32, %c0_i32_0, %c0_i32_1 : i32, i32, i32
  }
  func.func @transform_4(%arg0: i32) -> (i32, i32) {
    %c0_i32 = arith.constant 0 : i32
    %c0_i32_0 = arith.constant 0 : i32
    %c0_i32_1 = arith.constant 0 : i32
    return %c0_i32, %c0_i32_0 : i32, i32
  }
  func.func @transform_5(%arg0: i32) -> (i32, i32, i32) {
    %c0_i32 = arith.constant 0 : i32
    %c0_i32_0 = arith.constant 0 : i32
    %c0_i32_1 = arith.constant 0 : i32
    return %arg0, %c0_i32, %c0_i32_0 : i32, i32, i32
  }
}

</mosaic_0001>

<bundles_post_ra>
// kernel: tpu_custom_call.1
= control target key start
LH: loop header
LB: loop body
LE: loop exit
PB: predicated region body
PF: predicated region fallthrough
CT: control target
= control target key end

     0   :  { %10 = vsyncpa [#allocation3], 0  ;;  %s1277_s0 = inlined_call_operand.hbm [shape: f32[2,8,32], index: 0, kind: input, shape index: {}]   ;;  %s1278_s1 = inlined_call_operand.hbm [shape: f32[1,32,32], index: 1, kind: input, shape index: {}]   ;;  %s1279_s2 = inlined_call_operand.hbm [shape: f32[32,32], index: 2, kind: input, shape index: {}]   ;;  %s1280_s3 = inlined_call_operand.hbm [shape: f32[1,32,32], index: 3, kind: input, shape index: {}]   ;;  %s1281_s4 = inlined_call_operand.vmem [shape: f32[1,32], index: 4, kind: input, shape index: {}]   ;;  %s1282_s5 = inlined_call_operand.vmem [shape: f32[2,1,1], index: 5, kind: output, shape index: {}]  }
   0x1   :  { %12 = vsyncpa [#allocation3 + $0x1], 0 }
   0x2   :  { %13 = vsyncpa [#allocation5], 0 }
   0x3   :  { %14 = vsyncpa [#allocation8], 0  ;;  %s1097_s18 = smov 0   ;;  %s1099_s19 = smov 0  }
   0x4   :  { %s1101_s20 = smov 0   ;;  %s1103_s21 = smov 0  }
   0x5 LB: > { %s1116_s22 = sadd.s32 4294967295, %s1057_s21   ;;  %p40_p0 = scmp.ne.s32.totalorder %s1049_s19, %s1045_s18  ;;  %s1057_s21 = sphi %s1103_s21, %s1300_s21   ;;  %s1053_s20 = sphi %s1101_s20, %s1299_s20   ;;  %s1049_s19 = sphi %s1099_s19, %s1298_s19   ;;  %s1045_s18 = sphi %s1097_s18, %s1297_s18  }
   0x6   : > { %p1283_p1 = scmp.eq.s32.totalorder %s1116_s22, 0  ;;  %p741_p2 = scmp.ge.s32.totalorder %s1057_s21, 1 }
   0x7   : > { %p161_p3 = scmp.lt.s32.totalorder %s1057_s21, 3  ;;  %s1059_s25 = smov [#allocation4]  }
   0x8   : > { %p1124_p4 = por %p1283_p1, %p40_p0  ;;  %s173_s26 = sshll.u32 %s1059_s25, 4  ;;  %s174_s26 = int_to_ptr.vmem [resolvable:$true] %s173_s26 }
   0x9   : > { %p1128_p5 = pnand %p741_p2, %p161_p3  ;;  %s1060_s28 = smov [#allocation6]  }
   0xa   : > { %s1286_s23 = scalar_select %p1124_p4, 1, 0 }
   0xb   : > { %s1287_s24 = scalar_select %p1128_p5, 1, 0 }
   0xc   : > { %p841_p6 = pneg %p1128_p5  ;;  %s186_s29 = sshll.u32 %s1060_s28, 4  ;;  %s187_s29 = int_to_ptr.vmem [resolvable:$true] %s186_s29 }
   0xd   : > { %s1061_s30 = smov [#allocation7]   ;;  %s920_s7 = scalar_lea.vmem %s174_s26, 512 }
   0xe   : > { %p1136_p7 = pnand %p841_p6, %p1283_p1  ;;  %s199_s6 = sshll.u32 %s1061_s30, 4  ;;  %s200_s6 = int_to_ptr.vmem [resolvable:$true] %s199_s6 }
   0xf   : > { %p921_p9 = scmp.ne.s32.totalorder %s174_s26, %s920_s7  ;;  %p928_p12 = scmp.lt.s32.totalorder %s174_s26, %s174_s26 }
  0x10   : > { %p911_p8 = pneg %p1136_p7  ;;  %p929_p13 = scmp.lt.s32.totalorder %s920_s7, %s920_s7 }
  0x12   : > { %p923_p10 = pnand %p921_p9, %p911_p8  ;;  %p930_p0 = por %p929_p13, %p928_p12 }
  0x14   : > { %p924_p11 = pneg %p923_p10 }
  0x16   : > { %p931_p2 = pnand %p930_p0, %p924_p11 }
  0x18   : > { %934 = shalt.err (!%p931_p2)
}
  0x19   : > { %s1062_s8 = smov 128   ;;  %s1063_s9 = smov 8  }
  0x1a   : > { %844 = dma.hbm_to_vmem [thread:$0]  (!%p1136_p7), %s1278_s1, 512, %s174_s26, [#allocation5], %s1062_s8, %s1062_s8, %s1063_s9  }
  0x1b   : > { %s946_s12 = scalar_lea.vmem %s187_s29, 512  ;;  %p954_p10 = scmp.lt.s32.totalorder %s187_s29, %s187_s29 }
  0x1c   : > { %p947_p3 = scmp.ne.s32.totalorder %s187_s29, %s946_s12  ;;  %p955_p1 = scmp.lt.s32.totalorder %s946_s12, %s946_s12 }
  0x1e   : > { %p949_p6 = pnand %p947_p3, %p911_p8  ;;  %p956_p12 = por %p955_p1, %p954_p10 }
  0x20   : > { %p950_p9 = pneg %p949_p6 }
  0x22   : > { %p957_p11 = pnand %p956_p12, %p950_p9 }
  0x24   : > { %960 = shalt.err (!%p957_p11)
}
  0x25   : > { %847 = dma.hbm_to_vmem [thread:$0]  (!%p1136_p7), %s1279_s2, 512, %s187_s29, [#allocation5], %s1062_s8, %s1062_s8, %s1063_s9  }
  0x26   : > { %s972_s15 = scalar_lea.vmem %s200_s6, 512  ;;  %p980_p3 = scmp.lt.s32.totalorder %s200_s6, %s200_s6 }
  0x27   : > { %p973_p13 = scmp.ne.s32.totalorder %s200_s6, %s972_s15  ;;  %p981_p6 = scmp.lt.s32.totalorder %s972_s15, %s972_s15 }
  0x29   : > { %p975_p0 = pnand %p973_p13, %p911_p8  ;;  %p982_p4 = por %p981_p6, %p980_p3 }
  0x2b   : > { %p976_p2 = pneg %p975_p0 }
  0x2d   : > { %p983_p1 = pnand %p982_p4, %p976_p2 }
  0x2f   : > { %986 = shalt.err (!%p983_p1)
}
  0x30   : > { %850 = dma.hbm_to_vmem [thread:$0]  (!%p1136_p7), %s1280_s3, 512, %s200_s6, [#allocation8], %s1062_s8, %s1062_s8, %s1063_s9  }
  0x31   : > { %s1167_s18 = sadd.s32 1, %s1057_s21   ;;  %s27_s26 = sadd.s32 1, %s1053_s20 }
  0x32   : > { %s24_s25 = ssub.s32 %s1057_s21, %s1167_s18  ;;  %p34_p8 = scmp.ne.s32.totalorder %s1053_s20, %s1049_s19 }
  0x33   : > { %p25_p4 = scmp.eq.s32.totalorder %s24_s25, 0  ;;  %p35_p9 = scmp.eq.s32.totalorder %s1057_s21, 0 }
  0x34   : > { %p858_p10 = scmp.lt.s32.totalorder %s1057_s21, 2  ;;  %s216_s28 = sand.u32 1, %s1053_s20  }
  0x35   : > { %s1177_s27 = scalar_select %p25_p4, %s1053_s20, %s27_s26  }
  0x36   : > { %p36_p12 = por %p35_p9, %p34_p8  ;;  %s746_s29 = sshll.u32 %s216_s28, 3 }
  0x37   : > { %s747_s30 = sshll.u32 %s1057_s21, 7  ;;  %s220_s6 = scalar_lea.vmem [#allocation2], %s746_s29 }
  0x38   : > { %s1184_s11 = scalar_lea.hbm %s1277_s0, %s747_s30  ;;  %s227_s8 = sshll.u32 %s220_s6, 4  ;;  %s228_s8 = int_to_ptr.vmem [resolvable:$true] %s227_s8 }
  0x39   : > { %p1186_p7 = pnand %p858_p10, %p36_p12  ;;  %s217_s12 = scalar_lea.sflag [#allocation3], %s216_s28 }
  0x3a   : > { %s987_s13 = scalar_lea.hbm %s1184_s11, 128  ;;  %s992_s15 = scalar_lea.hbm %s1277_s0, 256 }
  0x3b   : > { %p988_p11 = scmp.ne.s32.totalorder %s1184_s11, %s987_s13  ;;  %p989_p13 = pneg %p1186_p7 }
  0x3c   : > { %p993_p3 = scmp.lt.s32.totalorder %s1184_s11, %s1277_s0  ;;  %p994_p6 = scmp.lt.s32.totalorder %s992_s15, %s987_s13 }
  0x3d   : > { %p990_p0 = pnand %p989_p13, %p988_p11 }
  0x3e   : > { %p995_p1 = por %p994_p6, %p993_p3 }
  0x3f   : > { %p991_p2 = pneg %p990_p0 }
  0x41   : > { %p996_p4 = pnand %p995_p1, %p991_p2 }
  0x43   : > { %999 = shalt.err (!%p996_p4)
}
  0x44   : > { %s1000_s25 = scalar_lea.vmem %s228_s8, 128  ;;  %s1064_s26 = smov [#allocation2]  }
  0x45   : > { %p1001_p8 = scmp.ne.s32.totalorder %s228_s8, %s1000_s25  ;;  %s1005_s28 = sshll.u32 %s1064_s26, 4  ;;  %s1006_s28 = int_to_ptr.vmem [resolvable:$false] %s1005_s28 }
  0x46   : > { %s1007_s29 = scalar_lea.vmem %s1006_s28, 256  ;;  %p1008_p12 = scmp.lt.s32.totalorder %s228_s8, %s1006_s28 }
  0x47   : > { %p1003_p9 = pnand %p1001_p8, %p989_p13  ;;  %p1009_p11 = scmp.lt.s32.totalorder %s1007_s29, %s1000_s25 }
  0x49   : > { %p1004_p10 = pneg %p1003_p9  ;;  %p1010_p0 = por %p1009_p11, %p1008_p12 }
  0x4b   : > { %p1011_p5 = pnand %p1010_p0, %p1004_p10 }
  0x4d   : > { %1014 = shalt.err (!%p1011_p5)
}
  0x4e   : > { %854 = dma.hbm_to_vmem [thread:$0]  (!%p1186_p7), %s1184_s11, 128, %s228_s8, %s217_s12  }
  0x4f   : > { %p1290_p2 = scmp.ne.s32.totalorder %s1287_s24, 0 }
  0x50   : > { %s238_s30 = sand.u32 (!%p1290_p2), 1, %s1049_s19   ;;  %p1291_p13 = scmp.ne.s32.totalorder (!%p1290_p2), %s1286_s23, 0 }
  0x51   : > { %236 = sbr.rel (%p1290_p2) target bundleno = 2237 (0x8bd), region = 40  ;;  %s749_s7 = sshll.u32 (!%p1290_p2), %s238_s30, 3 }
  0x52   : > { %s239_s10 = scalar_lea.sflag (!%p1290_p2), [#allocation3], %s238_s30  ;;  %s242_s6 = scalar_lea.vmem (!%p1290_p2), [#allocation2], %s749_s7 }
  0x56   : > { %1032 = dma.done.wait (%p1291_p13), %s239_s10, 128  }
  0x57   : > { %1034 = vsyncadd (%p1291_p13), %s239_s10, 4294967168  ;;  %p1292_p5 = scmp.eq.s32.totalorder %s1116_s22, 0 }
  0x59   : > { %1036 = dma.done.wait (%p1292_p5), [#allocation5], 1024   ;;  %p1293_p3 = pmov %p1292_p5 }
  0x5b   : > { %1038 = vsyncadd (%p1293_p3), [#allocation5], 4294966272  ;;  %p1294_p7 = pmov %p1293_p3 }
  0x5c   : > { %p1295_p6 = pmov %p1293_p3 }
  0x5d   : > { %1040 = dma.done.wait (%p1294_p7), [#allocation8], 512  }
  0x5e   : > { %1042 = vsyncadd (%p1295_p6), [#allocation8], 4294966784  ;;  %v1065_v0 = vmov 0.0   ;;  %vm1066_vm0 = vmmov 0   ;;  %v287_v1 = vld [vmem:[#allocation4 + $0x10] sm:$0xff]  ;;  %v288_v2 = vld [vmem:[#allocation4 + $0x18] sm:$0xff] }
  0x5f   : > { %779 = vmatprep.subr.bf16.mxu0 %v1065_v0  ;;  %783 = vmatprep.mubr.msk.bf16.mxu0 %vm1066_vm0, %v1065_v0  ;;  %v285_v3 = vld [vmem:[#allocation4] sm:$0xff]  ;;  %v290_v4 = vpack.c.bf16 %v288_v2, %v287_v1  ;;  %v286_v5 = vld [vmem:[#allocation4 + $0x8] sm:$0xff]  ;;  %v283_v6 = vld [vmem:[%s242_s6] sm:$0xff]  ;;  %vm291_vm1 = vcmask 261120   ;;  %vm379_vm2 = vcmask 64512   ;;  %vm395_vm3 = vcmask 1043456  }
  0x60   : > { %787 = vmatprep.subr.bf16.mxu1 %v1065_v0  ;;  %789 = vmatprep.mubr.msk.bf16.mxu1 %vm1066_vm0, %v1065_v0  ;;  %v284_v7 = vpack.c.bf16 %v283_v6, %v283_v6  ;;  %v289_v8 = vpack.c.bf16 %v286_v5, %v285_v3  ;;  %v441_v26 = vld [vmem:[#allocation7 + $0x10] sm:$0xff]  ;;  %v442_v27 = vld [vmem:[#allocation7 + $0x18] sm:$0xff]  ;;  %v439_v28 = vld [vmem:[#allocation7] sm:$0xff]  ;;  %vm582_vm4 = vcmask 57344   ;;  %vm646_vm5 = vcmask 253952   ;;  %p279_p1 = scmp.lt.s32.totalorder %s1116_s22, 1 }
  0x61   : > { %780 = vmatpush3.bf16.msra.mxu0 %v290_v4  ;;  %v444_v29 = vpack.c.bf16 %v442_v27, %v441_v26  ;;  %v440_v30 = vld [vmem:[#allocation7 + $0x8] sm:$0xff]  ;;  %v491_v36 = vld [vmem:[#allocation6 + $0x10] sm:$0xff]  ;;  %v492_v37 = vld [vmem:[#allocation6 + $0x18] sm:$0xff]  ;;  %vm650_vm6 = vcmask 0  }
  0x62   : > { %781 = vmatprep.subr.bf16.mxu0 %v1065_v0  ;;  %v293_v9 = vsel %vm291_vm1, %v284_v7, 0  ;;  %v396_v25 = vsel %vm395_vm3, %v284_v7, 0  ;;  %v443_v31 = vpack.c.bf16 %v440_v30, %v439_v28  ;;  %v489_v38 = vld [vmem:[#allocation6] sm:$0xff]  ;;  %v494_v39 = vpack.c.bf16 %v492_v37, %v491_v36  ;;  %v490_v40 = vld [vmem:[#allocation6 + $0x8] sm:$0xff]  ;;  %s1302_s22 = smov (!%p279_p1, %s1116_s22), 1 }
  0x63   : > { %788 = vmatpush3.bf16.xpose.msra.mxu1 %v293_v9  ;;  %v493_v41 = vpack.c.bf16 %v490_v40, %v489_v38  ;;  %v640_v9 = vld [vmem:[%s1281_s4] sm:$0x1]  ;;  %s281_s9 = scalar_lea.vmem %s1282_s5, %s1302_s22 }
  0x64   : > { %799 = vmatprep.subr.bf16.mxu1 %v1065_v0 }
  0x65   : > { %782 = vmatpush3.bf16.msra.mxu0 %v289_v8 }
  0x66   : > { %793 = vmatprep.subr.bf16.mxu0 %v1065_v0 }
  0x68   : > { %784 = vmatmul.mubr.msk.bf16.vlgmr.msra.gmra.mxu0 %vm291_vm1, %v284_v7 }
  0x69   : > { %795 = vmatprep.mubr.msk.bf16.mxu0 %vm1066_vm0, %v1065_v0  ;;  %794 = vmatpush3.bf16.msra.mxu0 %v396_v25 }
  0x6a   : > { %807 = vmatprep.subr.bf16.mxu0 %v1065_v0 }
 0x128   : > { %v329_v10 = vpop.f32.mrf.mxu0 }
 0x129   : > { %v335_v11 = vpack.c.bf16 %v329_v10, %v329_v10  ;;  %v641_v10 = vpack.c.bf16 %v640_v9, %v640_v9 }
 0x12a   : > { %v785_v12 = vpop.f32.mrf.mxu0 }
 0x12b   : > { %790 = vmatmul.mubr.msk.bf16.vlgmr.msra.gmra.mxu1 %vm291_vm1, %v335_v11 }
 0x12c   : > { %v332_v13 = vpop.f32.mrf.mxu0  ;;  %803 = vmatprep.mubr.msk.bf16.mxu1 %vm1066_vm0, %v1065_v0  ;;  %800 = vmatpush3.bf16.msra.mxu1 %v444_v29 }
 0x12d   : > { %801 = vmatprep.subr.bf16.mxu1 %v1065_v0  ;;  %v643_v13 = vunpack.c.l.bf16 %v641_v10 }
 0x12e   : > { %v786_v14 = vpop.f32.mrf.mxu0 }
 0x130   : > { %802 = vmatpush3.bf16.msra.mxu1 %v443_v31 }
 0x131   : > { %815 = vmatprep.subr.bf16.mxu1 %v1065_v0 }
 0x1eb   : > { %v373_v15 = vpop.f32.mrf.mxu1 }
 0x1ec   : > { %v380_v16 = vsel %vm379_vm2, %v373_v15, -inf }
 0x1ed   : > { %381 = vmax.xlane.f32.xlu0 %v380_v16  ;;  %v791_v17 = vpop.f32.mrf.mxu1 }
 0x1ef   : > { %v376_v18 = vpop.f32.mrf.mxu1 }
 0x1f1   : > { %v792_v19 = vpop.f32.mrf.mxu1 }
 0x276   : > { %v382_v20 = vpop.xlane.xlu0 %381 }
 0x277   : > { %v383_v21 = vsub.f32 %v373_v15, %v382_v20 }
 0x279   : > { %v384_v22 = vmul.f32 1.442695, %v383_v21 }
 0x27b   : > { %901 = vpow2.f32 %v384_v22 }
 0x288   : > { %v902_v23 = vpop.eup %901 }
 0x289   : > { %v386_v24 = vsel %vm379_vm2, %v902_v23, 0.0 }
 0x28a   : > { %387 = vadd.xlane.f32.xlu0 %v386_v24 }
 0x313   : > { %v388_v32 = vpop.xlane.xlu0 %387 }
 0x314   : > { %903 = vrcp.f32 %v388_v32 }
 0x321   : > { %v904_v33 = vpop.eup %903 }
 0x322   : > { %v390_v34 = vmul.f32 %v904_v33, %v902_v23 }
 0x324   : > { %v391_v35 = vpack.c.bf16 %v390_v34, %v390_v34 }
 0x326   : > { %796 = vmatmul.mubr.msk.bf16.vlgmr.msra.gmra.mxu0 %vm379_vm2, %v391_v35 }
 0x327   : > { %811 = vmatprep.mubr.msk.bf16.mxu0 %vm1066_vm0, %v1065_v0  ;;  %808 = vmatpush3.bf16.msra.mxu0 %v494_v39 }
 0x328   : > { %809 = vmatprep.subr.bf16.mxu0 %v1065_v0 }
 0x32b   : > { %810 = vmatpush3.bf16.msra.mxu0 %v493_v41 }
 0x32c   : > { %821 = vmatprep.subr.bf16.mxu0 %v1065_v0 }
 0x3e6   : > { %v432_v42 = vpop.f32.mrf.mxu0 }
 0x3e7   : > { %v438_v43 = vpack.c.bf16 %v432_v42, %v432_v42 }
 0x3e8   : > { %v797_v44 = vpop.f32.mrf.mxu0 }
 0x3e9   : > { %804 = vmatmul.mubr.msk.bf16.vlgmr.msra.gmra.mxu1 %vm291_vm1, %v438_v43 }
 0x3ea   : > { %v435_v45 = vpop.f32.mrf.mxu0  ;;  %817 = vmatprep.mubr.msk.bf16.mxu1 %vm1066_vm0, %v1065_v0 }
 0x3ec   : > { %v798_v46 = vpop.f32.mrf.mxu0 }
 0x4a9   : > { %v482_v47 = vpop.f32.mrf.mxu1 }
 0x4aa   : > { %v488_v48 = vpack.c.bf16 %v482_v47, %v482_v47 }
 0x4ab   : > { %v805_v49 = vpop.f32.mrf.mxu1 }
 0x4ac   : > { %812 = vmatmul.mubr.msk.bf16.vlgmr.msra.gmra.mxu0 %vm291_vm1, %v488_v48  ;;  %v496_v50 = vsel %vm291_vm1, %v488_v48, 0  ;;  %v598_v51 = vsel %vm395_vm3, %v488_v48, 0 }
 0x4ad   : > { %v485_v52 = vpop.f32.mrf.mxu1  ;;  %816 = vmatpush3.bf16.xpose.msra.mxu1 %v496_v50  ;;  %822 = vmatpush3.bf16.msra.mxu0 %v598_v51 }
 0x4ae   : > { %823 = vmatprep.mubr.msk.bf16.mxu0 %vm1066_vm0, %v1065_v0 }
 0x4af   : > { %v806_v53 = vpop.f32.mrf.mxu1 }
 0x56c   : > { %v532_v54 = vpop.f32.mrf.mxu0 }
 0x56d   : > { %v538_v55 = vpack.c.bf16 %v532_v54, %v532_v54 }
 0x56e   : > { %v813_v56 = vpop.f32.mrf.mxu0 }
 0x56f   : > { %818 = vmatmul.mubr.msk.bf16.vlgmr.msra.gmra.mxu1 %vm291_vm1, %v538_v55 }
 0x570   : > { %v535_v57 = vpop.f32.mrf.mxu0 }
 0x572   : > { %v814_v58 = vpop.f32.mrf.mxu0 }
 0x62f   : > { %v576_v59 = vpop.f32.mrf.mxu1 }
 0x630   : > { %v583_v60 = vsel %vm582_vm4, %v576_v59, -inf }
 0x631   : > { %584 = vmax.xlane.f32.xlu1 %v583_v60  ;;  %v819_v61 = vpop.f32.mrf.mxu1 }
 0x633   : > { %v579_v62 = vpop.f32.mrf.mxu1 }
 0x635   : > { %v820_v63 = vpop.f32.mrf.mxu1 }
 0x6ba   : > { %v585_v1 = vpop.xlane.xlu1 %584 }
 0x6bb   : > { %v586_v2 = vsub.f32 %v576_v59, %v585_v1 }
 0x6bd   : > { %v587_v3 = vmul.f32 1.442695, %v586_v2 }
 0x6bf   : > { %905 = vpow2.f32 %v587_v3 }
 0x6cc   : > { %v906_v0 = vpop.eup %905 }
 0x6cd   : > { %v589_v4 = vsel %vm582_vm4, %v906_v0, 0.0 }
 0x6ce   : > { %590 = vadd.xlane.f32.xlu1 %v589_v4 }
 0x757   : > { %v591_v5 = vpop.xlane.xlu1 %590 }
 0x758   : > { %907 = vrcp.f32 %v591_v5 }
 0x765   : > { %v908_v6 = vpop.eup %907 }
 0x766   : > { %v593_v7 = vmul.f32 %v908_v6, %v906_v0 }
 0x768   : > { %v594_v8 = vpack.c.bf16 %v593_v7, %v593_v7 }
 0x76a   : > { %824 = vmatmul.mubr.msk.bf16.vlgmr.msra.gmra.mxu0 %vm379_vm2, %v594_v8 }
 0x82a   : > { %v634_v11 = vpop.f32.mrf.mxu0 }
 0x82b   : > { %v642_v12 = vpack.c.bf16 %v634_v11, %v634_v11 }
 0x82c   : > { %v825_v14 = vpop.f32.mrf.mxu0 }
 0x82d   : > { %v644_v15 = vunpack.c.l.bf16 %v642_v12 }
 0x82e   : > { %v637_v16 = vpop.f32.mrf.mxu0 }
 0x82f   : > { %v645_v17 = vmul.f32 %v644_v15, %v643_v13 }
 0x830   : > { %v826_v18 = vpop.f32.mrf.mxu0 }
 0x831   : > { %v647_v19 = vsel %vm646_vm5, %v645_v17, 0.0 }
 0x832   : > { %648 = vadd.xlane.f32.xlu0 %v647_v19 }
 0x8bb   : > { %v649_v20 = vpop.xlane.xlu0 %648 }
 0x8bc   : > { %651 = vst.msk [vmem:[%s281_s9] sm:$0x1] %vm650_vm6, %v649_v20 }
 0x8bd PF: > { %s1296_s12 = smov %s1167_s18  ;;  %p17_p4 = scmp.ge.s32.totalorder %s1167_s18, 4  }
 0x8be   : > { %s1297_s18 = smov %s1049_s19  ;;  %s1298_s19 = smov %s1053_s20 }
 0x8bf   : > { %s1299_s20 = smov %s1177_s27  ;;  %s1300_s21 = smov %s1296_s12 }
 0x8c0   :  { %19 = sbr.rel (!%p17_p4) target bundleno = 5 (0x5), region = 92 }
 0x8c5   :  { %669 = vsyncpa [#allocation3], 1 }
 0x8c6   :  { %671 = vsyncpa [#allocation3 + $0x1], 1 }
 0x8c7   :  { %672 = vsyncpa [#allocation5], 1 }
 0x8c8   :  { %673 = vsyncpa [#allocation8], 1 }

</bundles_post_ra>
